<compile_context>
chip_gen: v6e
topology: v6e:2x2x1
jax: 0.10.0
libtpu: 0.0.40
codegen_flags: <defaults>
</compile_context>

<pallas_src>
import functools
import math

import jax
import jax.numpy as jnp
from jax.experimental import pallas as pl
from jax.experimental.pallas import tpu as pltpu

_NEG_LOG_1E4 = -math.log(1e-4)  # = log(1e4) ~ 9.2103403719761836


def _sce_c2_kernel(rows_ref, pred_ref, lab_ref, out_ref, *, a, b):
    tile_rows = pred_ref.shape[0]            # static; always a multiple of 8

    # (TR, 256): lanes 2j / 2j+1 hold class-0 / class-1 logits of sample j of the row.
    x = pred_ref[...].astype(jnp.float32)
    lab = lab_ref[...]                        # (TR, 128) int32

    # Deinterleave even/odd lanes with one (otherwise-idle) MXU matmul against a
    # constant +/-1 selection matrix:  diff[r, j] = x[r, 2j+1] - x[r, 2j].
    l_idx = jax.lax.broadcasted_iota(jnp.int32, (256, 128), 0)
    j_idx = jax.lax.broadcasted_iota(jnp.int32, (256, 128), 1)
    sel = (jnp.where(l_idx == 2 * j_idx + 1, 1.0, 0.0)
           - jnp.where(l_idx == 2 * j_idx, 1.0, 0.0)).astype(jnp.float32)
    diff = jnp.dot(x, sel, preferred_element_type=jnp.float32,
                   precision=jax.lax.Precision.HIGHEST)        # (TR, 128)

    # d = x_label - x_other   (binary specialization)
    sgn = 2.0 * lab.astype(jnp.float32) - 1.0                  # {-1, +1}
    d = sgn * diff

    # ce  = -log softmax[label] = -log sigmoid(d) = softplus(-d)      (stable)
    # rce = -log(1e-4) * clip(softmax[other], 1e-7, 1);  softmax[other] = sigmoid(-d)
    e = jnp.exp(-jnp.abs(d))                                   # in (0, 1]
    inv = pl.reciprocal(1.0 + e, approx=False)                 # exact: test tol 1e-5
    ce = jnp.maximum(-d, 0.0) + jnp.log(1.0 + e)
    p_other = jnp.where(d <= 0.0, inv, e * inv)
    rce = _NEG_LOG_1E4 * jnp.clip(p_other, 1e-7, 1.0)
    contrib = a * ce + b * rce                                 # (TR, 128)

    # Mask rows of a ragged last tile (each row == 128 whole samples).  Keep this a
    # select (jnp.where), not a multiply: garbage tail logits may be Inf/NaN.
    r_idx = jax.lax.broadcasted_iota(jnp.int32, (tile_rows, 1), 0)
    valid = (pl.program_id(0) * tile_rows + r_idx) < rows_ref[0]
    contrib = jnp.where(valid, contrib, 0.0)

    # Lane-wise partial sums -> (8, 128): pure vreg adds (no cross-lane reduce),
    # full-width unmasked store.
    out_ref[...] = jnp.sum(contrib.reshape(tile_rows // 8, 8, 128), axis=0)


def _sce_jax_sum(pred, labels, num_classes, a, b):
    """Pure-JAX SUM of per-sample SCE losses (ragged tails / tiny batches / C != 2)."""
    logits = pred.astype(jnp.float32)
    log_sm = jax.nn.log_softmax(logits, axis=1)
    oh = jax.nn.one_hot(labels, num_classes, dtype=jnp.float32)
    ce = -jnp.sum(oh * log_sm, axis=1)
    sm = jnp.clip(jax.nn.softmax(logits, axis=1), 1e-7, 1.0)
    rce = -jnp.sum(sm * jnp.log(jnp.clip(oh, 1e-4, 1.0)), axis=1)
    return jnp.sum(a * ce + b * rce)


def sce_loss(pred, labels, num_classes=2, a=0.1, b=1.0, tile_rows=2048):
    """pred: (N, C) float logits, labels: (N,) int.  Returns scalar f32 loss."""
    n, c = pred.shape
    a = float(a)
    b = float(b)

    if c != 2 or num_classes != 2 or n < 1024:
        # TODO(synk): general-C and tiny-batch (<1024 samples) paths stay in plain
        # JAX; the Pallas kernel is specialized to the module's binary default.
        return _sce_jax_sum(pred, labels, num_classes, a, b) / jnp.float32(n)

    labels = labels if labels.dtype == jnp.int32 else labels.astype(jnp.int32)

    rows = n // 128                      # >= 8 here
    n_bulk = rows * 128
    tr = max(8, min((int(tile_rows) // 8) * 8, (rows // 8) * 8))
    num_tiles = pl.cdiv(rows, tr)

    # Free row-major reinterpretations (no HBM copy): classes interleave on lanes.
    # (Only when N is not a multiple of 128 does the prefix slice cost anything.)
    pred_bulk = pred if n_bulk == n else pred[:n_bulk]
    lab_bulk = labels if n_bulk == n else labels[:n_bulk]
    pred2 = pred_bulk.reshape(rows, 256)
    lab2 = lab_bulk.reshape(rows, 128)
    rows_arr = jnp.array([rows], dtype=jnp.int32)      # scalar-prefetched row count

    kernel = functools.partial(_sce_c2_kernel, a=a, b=b)
    partials = pl.pallas_call(
        kernel,
        out_shape=jax.ShapeDtypeStruct((num_tiles * 8, 128), jnp.float32),
        grid_spec=pltpu.PrefetchScalarGridSpec(
            num_scalar_prefetch=1,
            grid=(num_tiles,),
            in_specs=[
                pl.BlockSpec((tr, 256), lambda i, rows_s: (i, 0)),   # pred tile
                pl.BlockSpec((tr, 128), lambda i, rows_s: (i, 0)),   # labels tile
            ],
            out_specs=pl.BlockSpec((8, 128), lambda i, rows_s: (i, 0)),
        ),
        compiler_params=pltpu.CompilerParams(
            dimension_semantics=("parallel",),
            vmem_limit_bytes=48 * 1024 * 1024,
        ),
    )(rows_arr, pred2, lab2)

    total = jnp.sum(partials)
    if n_bulk != n:                       # <128-sample ragged tail in plain JAX
        total = total + _sce_jax_sum(pred[n_bulk:], labels[n_bulk:], 2, a, b)
    return total / jnp.float32(n)


def _sce_ref(pred, labels, num_classes=2, a=0.1, b=1.0):
    """Pure-JAX mirror of the PyTorch module, for sanity checking."""
    logits = pred.astype(jnp.float32)
    log_sm = jax.nn.log_softmax(logits, axis=1)
    ce = -jnp.mean(jnp.take_along_axis(log_sm, labels[:, None], axis=1))
    sm = jnp.clip(jax.nn.softmax(logits, axis=1), 1e-7, 1.0)
    oh = jnp.clip(jax.nn.one_hot(labels, num_classes, dtype=jnp.float32), 1e-4, 1.0)
    rce = -jnp.sum(sm * jnp.log(oh), axis=1)
    return a * ce + b * jnp.mean(rce)


if __name__ == "__main__":
    num_classes = 2
    key = jax.random.PRNGKey(0)
    k1, k2 = jax.random.split(key)

    # Case 1: kernel bulk (8 rows, single tile) + 40-sample ragged tail in JAX.
    n1 = 1064
    pred1 = jax.random.normal(k1, (n1, num_classes), dtype=jnp.float32) * 3.0
    labels1 = jax.random.randint(k2, (n1,), 0, num_classes, dtype=jnp.int32)
    loss1 = jax.block_until_ready(sce_loss(pred1, labels1, num_classes, a=0.1, b=1.0))
    ref1 = _sce_ref(pred1, labels1, num_classes, a=0.1, b=1.0)
    assert jnp.allclose(loss1, ref1, rtol=1e-5, atol=1e-5), (loss1, ref1)

    # Case 2: multi-tile grid with a ragged last tile (exercises the row mask).
    n2 = 2560
    k3, k4 = jax.random.split(k2)
    pred2 = jax.random.normal(k3, (n2, num_classes), dtype=jnp.float32) * 3.0
    labels2 = jax.random.randint(k4, (n2,), 0, num_classes, dtype=jnp.int32)
    loss2 = jax.block_until_ready(
        sce_loss(pred2, labels2, num_classes, a=0.1, b=1.0, tile_rows=8))
    ref2 = _sce_ref(pred2, labels2, num_classes, a=0.1, b=1.0)
    assert jnp.allclose(loss2, ref2, rtol=1e-5, atol=1e-5), (loss2, ref2)

    print("KERNEL_OK")
</pallas_src>

<mosaic_0001>
module attributes {stable_mosaic.version = 11 : i64} {
  func.func @_sce_c2_kernel(%arg0: i32, %arg1: memref<1xi32, #tpu.memory_space<smem>>, %arg2: memref<8x256xf32, #tpu.memory_space<vmem>>, %arg3: memref<8x128xi32, #tpu.memory_space<vmem>>, %arg4: memref<8x128xf32, #tpu.memory_space<vmem>>) attributes {dimension_semantics = [#tpu.dimension_semantics<parallel>], iteration_bounds = array<i64: 1>, scalar_prefetch = 1 : i64, scratch_operands = 0 : i64, tpu.core_type = #tpu.core_type<tc>, window_params = [{transform_indices = @transform_0, window_bounds = array<i64: 8, 256>}, {transform_indices = @transform_1, window_bounds = array<i64: 8, 128>}, {transform_indices = @transform_2, window_bounds = array<i64: 8, 128>}]} {
    %c0 = arith.constant 0 : index
    %c0_0 = arith.constant 0 : index
    %0 = vector.load %arg2[%c0, %c0_0] : memref<8x256xf32, #tpu.memory_space<vmem>>, vector<8x256xf32>
    %c0_1 = arith.constant 0 : index
    %c0_2 = arith.constant 0 : index
    %1 = vector.load %arg3[%c0_1, %c0_2] : memref<8x128xi32, #tpu.memory_space<vmem>>, vector<8x128xi32>
    %2 = tpu.iota {dimensions = array<i32: 0>} : vector<256x128xi32>
    %3 = tpu.iota {dimensions = array<i32: 1>} : vector<256x128xi32>
    %c2_i32 = arith.constant 2 : i32
    %4 = vector.broadcast %c2_i32 : i32 to vector<256x128xi32>
    %5 = arith.muli %4, %3 : vector<256x128xi32>
    %c1_i32 = arith.constant 1 : i32
    %6 = vector.broadcast %c1_i32 : i32 to vector<256x128xi32>
    %7 = arith.addi %5, %6 : vector<256x128xi32>
    %8 = arith.cmpi eq, %2, %7 : vector<256x128xi32>
    %cst = arith.constant 1.000000e+00 : f32
    %cst_3 = arith.constant 0.000000e+00 : f32
    %9 = vector.broadcast %cst : f32 to vector<256x128xf32>
    %10 = vector.broadcast %cst_3 : f32 to vector<256x128xf32>
    %11 = arith.select %8, %9, %10 : vector<256x128xi1>, vector<256x128xf32>
    %c2_i32_4 = arith.constant 2 : i32
    %12 = vector.broadcast %c2_i32_4 : i32 to vector<256x128xi32>
    %13 = arith.muli %12, %3 : vector<256x128xi32>
    %14 = arith.cmpi eq, %2, %13 : vector<256x128xi32>
    %cst_5 = arith.constant 1.000000e+00 : f32
    %cst_6 = arith.constant 0.000000e+00 : f32
    %15 = vector.broadcast %cst_5 : f32 to vector<256x128xf32>
    %16 = vector.broadcast %cst_6 : f32 to vector<256x128xf32>
    %17 = arith.select %14, %15, %16 : vector<256x128xi1>, vector<256x128xf32>
    %18 = arith.subf %11, %17 : vector<256x128xf32>
    %cst_7 = arith.constant dense<0.000000e+00> : vector<8x128xf32>
    %19 = tpu.matmul %0, %18, %cst_7 {dimension_numbers = #tpu.dot_dimension_numbers<[1], [0], [0], [1], [0, 0, 1, 1], [], []>, precision = #tpu.contract_precision<fp32>} : vector<8x256xf32>, vector<256x128xf32>, vector<8x128xf32> -> vector<8x128xf32>
    %20 = arith.sitofp %1 : vector<8x128xi32> to vector<8x128xf32>
    %cst_8 = arith.constant 2.000000e+00 : f32
    %21 = vector.broadcast %cst_8 : f32 to vector<8x128xf32>
    %22 = arith.mulf %21, %20 : vector<8x128xf32>
    %cst_9 = arith.constant 1.000000e+00 : f32
    %23 = vector.broadcast %cst_9 : f32 to vector<8x128xf32>
    %24 = arith.subf %22, %23 : vector<8x128xf32>
    %25 = arith.mulf %24, %19 : vector<8x128xf32>
    %26 = math.absf %25 : vector<8x128xf32>
    %cst_10 = arith.constant 0.000000e+00 : f32
    %27 = vector.broadcast %cst_10 : f32 to vector<8x128xf32>
    %28 = arith.subf %27, %26 : vector<8x128xf32>
    %29 = math.exp %28 : vector<8x128xf32>
    %cst_11 = arith.constant 1.000000e+00 : f32
    %30 = vector.broadcast %cst_11 : f32 to vector<8x128xf32>
    %31 = arith.addf %30, %29 : vector<8x128xf32>
    %32 = tpu.reciprocal %31 : vector<8x128xf32> -> vector<8x128xf32>
    %cst_12 = arith.constant 0.000000e+00 : f32
    %33 = vector.broadcast %cst_12 : f32 to vector<8x128xf32>
    %34 = arith.subf %33, %25 : vector<8x128xf32>
    %cst_13 = arith.constant 0.000000e+00 : f32
    %35 = vector.broadcast %cst_13 : f32 to vector<8x128xf32>
    %36 = arith.maximumf %34, %35 : vector<8x128xf32>
    %cst_14 = arith.constant 1.000000e+00 : f32
    %37 = vector.broadcast %cst_14 : f32 to vector<8x128xf32>
    %38 = arith.addf %37, %29 : vector<8x128xf32>
    %39 = math.log %38 : vector<8x128xf32>
    %40 = arith.addf %36, %39 : vector<8x128xf32>
    %cst_15 = arith.constant 0.000000e+00 : f32
    %41 = vector.broadcast %cst_15 : f32 to vector<8x128xf32>
    %42 = arith.cmpf ole, %25, %41 : vector<8x128xf32>
    %43 = arith.mulf %29, %32 : vector<8x128xf32>
    %44 = arith.select %42, %32, %43 : vector<8x128xi1>, vector<8x128xf32>
    %cst_16 = arith.constant 1.000000e-07 : f32
    %cst_17 = arith.constant 1.000000e+00 : f32
    %45 = vector.broadcast %cst_16 : f32 to vector<8x128xf32>
    %46 = arith.maximumf %45, %44 : vector<8x128xf32>
    %47 = vector.broadcast %cst_17 : f32 to vector<8x128xf32>
    %48 = arith.minimumf %47, %46 : vector<8x128xf32>
    %cst_18 = arith.constant 9.21034049 : f32
    %49 = vector.broadcast %cst_18 : f32 to vector<8x128xf32>
    %50 = arith.mulf %49, %48 : vector<8x128xf32>
    %cst_19 = arith.constant 1.000000e-01 : f32
    %51 = vector.broadcast %cst_19 : f32 to vector<8x128xf32>
    %52 = arith.mulf %51, %40 : vector<8x128xf32>
    %cst_20 = arith.constant 1.000000e+00 : f32
    %53 = vector.broadcast %cst_20 : f32 to vector<8x128xf32>
    %54 = arith.mulf %53, %50 : vector<8x128xf32>
    %55 = arith.addf %52, %54 : vector<8x128xf32>
    %56 = tpu.iota {dimensions = array<i32: 0>} : vector<8x1xi32>
    %c8_i32 = arith.constant 8 : i32
    %57 = arith.muli %arg0, %c8_i32 : i32
    %58 = vector.broadcast %57 : i32 to vector<8x1xi32>
    %59 = arith.addi %58, %56 : vector<8x1xi32>
    %c0_21 = arith.constant 0 : index
    %60 = memref.load %arg1[%c0_21] : memref<1xi32, #tpu.memory_space<smem>>
    %61 = vector.broadcast %60 : i32 to vector<8x1xi32>
    %62 = arith.cmpi slt, %59, %61 : vector<8x1xi32>
    %cst_22 = arith.constant 0.000000e+00 : f32
    %63 = vector.shape_cast %62 : vector<8x1xi1> to vector<8x1xi1>
    %64 = vector.broadcast %63 : vector<8x1xi1> to vector<8x128xi1>
    %65 = vector.broadcast %cst_22 : f32 to vector<8x128xf32>
    %66 = arith.select %64, %55, %65 : vector<8x128xi1>, vector<8x128xf32>
    %67 = vector.shape_cast %66 : vector<8x128xf32> to vector<1x8x128xf32>
    %cst_23 = arith.constant dense<0.000000e+00> : vector<8x128xf32>
    %68 = vector.multi_reduction <add>, %67, %cst_23 [0] : vector<1x8x128xf32> to vector<8x128xf32>
    %c0_24 = arith.constant 0 : index
    %c0_25 = arith.constant 0 : index
    %69 = vector.load %arg4[%c0_24, %c0_25] : memref<8x128xf32, #tpu.memory_space<vmem>>, vector<8x128xf32>
    tpu.vector_store %arg4[%c0_24, %c0_25], %68 {strides = array<i32>} : memref<8x128xf32, #tpu.memory_space<vmem>>, vector<8x128xf32>,
    return
  }
  func.func @transform_0(%arg0: i32, %arg1: memref<1xi32, #tpu.memory_space<smem>>) -> (i32, i32) {
    %c0_i32 = arith.constant 0 : i32
    %c0_i32_0 = arith.constant 0 : i32
    return %arg0, %c0_i32 : i32, i32
  }
  func.func @transform_1(%arg0: i32, %arg1: memref<1xi32, #tpu.memory_space<smem>>) -> (i32, i32) {
    %c0_i32 = arith.constant 0 : i32
    %c0_i32_0 = arith.constant 0 : i32
    return %arg0, %c0_i32 : i32, i32
  }
  func.func @transform_2(%arg0: i32, %arg1: memref<1xi32, #tpu.memory_space<smem>>) -> (i32, i32) {
    %c0_i32 = arith.constant 0 : i32
    %c0_i32_0 = arith.constant 0 : i32
    return %arg0, %c0_i32 : i32, i32
  }
}

</mosaic_0001>

<bundles_post_ra>
// kernel: tpu_custom_call.1
= control target key start
LH: loop header
LB: loop body
LE: loop exit
PB: predicated region body
PF: predicated region fallthrough
CT: control target
= control target key end

     0   :  { %9 = vsyncpa [#allocation5], 0  ;;  %s2258_s0 = inlined_call_operand.<no memory space> [shape: s32[1], index: 0, kind: input, shape index: {}]   ;;  %s2259_s1 = inlined_call_operand.hbm [shape: f32[8,256], index: 1, kind: input, shape index: {}]   ;;  %s2260_s2 = inlined_call_operand.hbm [shape: s32[8,128], index: 2, kind: input, shape index: {}]   ;;  %s2261_s3 = inlined_call_operand.hbm [shape: f32[8,128], index: 3, kind: output, shape index: {}]  }
   0x1   :  { %10 = vsyncpa [#allocation8], 0 }
   0x2   :  { %11 = vsyncpa [#allocation6], 0  ;;  %s1437_s12 = smov [#allocation4]   ;;  %s1438_s14 = smov [#allocation7]  }
   0x3   :  { %s18_s13 = sshll.u32 %s1437_s12, 4  ;;  %s28_s15 = sshll.u32 %s1438_s14, 4  ;;  %s19_s13 = int_to_ptr.vmem [resolvable:$true] %s18_s13  ;;  %s29_s15 = int_to_ptr.vmem [resolvable:$true] %s28_s15 }
   0x4   :  { %s1379_s16 = scalar_lea.vmem %s19_s13, 256  ;;  %p1384_p1 = scmp.lt.s32.totalorder %s19_s13, %s19_s13 }
   0x5   :  { %p1380_p0 = scmp.ne.s32.totalorder %s19_s13, %s1379_s16  ;;  %p1385_p2 = scmp.lt.s32.totalorder %s1379_s16, %s1379_s16 }
   0x7   :  { %p1386_p3 = por %p1385_p2, %p1384_p1 }
   0x9   :  { %p1387_p4 = pnand %p1386_p3, %p1380_p0 }
   0xb   :  { %1390 = shalt.err (!%p1387_p4)
}
   0xc   :  { %21 = dma.hbm_to_vmem [thread:$0]  %s2259_s1, 256, %s19_s13, [#allocation5]  }
   0xd   :  { %s1399_s19 = scalar_lea.vmem %s29_s15, 128  ;;  %p1404_p6 = scmp.lt.s32.totalorder %s29_s15, %s29_s15 }
   0xe   :  { %p1400_p5 = scmp.ne.s32.totalorder %s29_s15, %s1399_s19  ;;  %p1405_p7 = scmp.lt.s32.totalorder %s1399_s19, %s1399_s19 }
  0x10   :  { %p1406_p8 = por %p1405_p7, %p1404_p6 }
  0x12   :  { %p1407_p9 = pnand %p1406_p8, %p1400_p5 }
  0x14   :  { %1410 = shalt.err (!%p1407_p9)
}
  0x15   :  { %31 = dma.hbm_to_vmem [thread:$0]  %s2260_s2, 128, %s29_s15, [#allocation8]  }
  0x16   :  { %1431 = dma.done.wait [#allocation5], 256  }
  0x17   :  { %1432 = vsyncadd [#allocation5], 4294967040  ;;  %v41_v0 = vlaneseq }
  0x18   :  { %1433 = dma.done.wait [#allocation8], 128  }
  0x19   :  { %1434 = vsyncadd [#allocation8], 4294967168  ;;  %v1467_v1 = vshrl.u32 %v41_v0, 7  ;;  %v75_v2 = vand.u32 127, %v41_v0  ;;  %v2279_v12 = vmov 0.0   ;;  %s1440_s22 = smov [#allocation9]  }
  0x1a   :  { %s1140_s23 = sshll.u32 %s1440_s22, 4  ;;  %s1141_s23 = int_to_ptr.vmem [resolvable:$true] %s1140_s23 }
  0x1b   :  { %2341 = vst [vmem:[#allocation13_spill] sm:$0xff] %v1467_v1  ;;  %v73_v3 = vadd.s32 248, %v1467_v1  ;;  %v1470_v4 = vmul.u32 2, %v75_v2  ;;  %v57_v5 = vadd.s32 120, %v1467_v1  ;;  %v72_v6 = vadd.s32 240, %v1467_v1  ;;  %s1411_s24 = scalar_lea.vmem %s1141_s23, 128  ;;  %p1416_p11 = scmp.lt.s32.totalorder %s1141_s23, %s1141_s23 }
  0x1c   :  { %v56_v7 = vadd.s32 112, %v1467_v1  ;;  %v71_v8 = vadd.s32 232, %v1467_v1  ;;  %v55_v9 = vadd.s32 104, %v1467_v1  ;;  %v70_v10 = vadd.s32 224, %v1467_v1  ;;  %p1412_p10 = scmp.ne.s32.totalorder %s1141_s23, %s1411_s24  ;;  %p1417_p12 = scmp.lt.s32.totalorder %s1411_s24, %s1411_s24 }
  0x1d   :  { %v1479_v11 = vadd.s32 1, %v1470_v4  ;;  %vm173_vm0 = vcmp.eq.s32.totalorder %v73_v3, %v1470_v4  ;;  %vm157_vm1 = vcmp.eq.s32.totalorder %v57_v5, %v1470_v4  ;;  %vm172_vm2 = vcmp.eq.s32.totalorder %v72_v6, %v1470_v4 }
  0x1e   :  { %v205_v13 = vsel %vm173_vm0, 1.0, %v2279_v12  ;;  %v189_v14 = vsel %vm157_vm1, 1.0, %v2279_v12  ;;  %v204_v15 = vsel %vm172_vm2, 1.0, %v2279_v12  ;;  %vm156_vm3 = vcmp.eq.s32.totalorder %v56_v7, %v1470_v4  ;;  %p1418_p13 = por %p1417_p12, %p1416_p11 }
  0x1f   :  { %vm109_vm4 = vcmp.eq.s32.totalorder %v73_v3, %v1479_v11  ;;  %vm93_vm5 = vcmp.eq.s32.totalorder %v57_v5, %v1479_v11  ;;  %vm108_vm6 = vcmp.eq.s32.totalorder %v72_v6, %v1479_v11  ;;  %vm92_vm7 = vcmp.eq.s32.totalorder %v56_v7, %v1479_v11 }
  0x20   :  { %v141_v16 = vsel %vm109_vm4, 1.0, %v2279_v12  ;;  %v125_v17 = vsel %vm93_vm5, 1.0, %v2279_v12  ;;  %v140_v18 = vsel %vm108_vm6, 1.0, %v2279_v12  ;;  %v124_v19 = vsel %vm92_vm7, 1.0, %v2279_v12  ;;  %p1419_p0 = pnand %p1418_p13, %p1412_p10 }
  0x21   :  { %v237_v20 = vsub.f32 %v141_v16, %v205_v13  ;;  %v221_v21 = vsub.f32 %v125_v17, %v189_v14  ;;  %v236_v22 = vsub.f32 %v140_v18, %v204_v15  ;;  %v188_v23 = vsel %vm156_vm3, 1.0, %v2279_v12 }
  0x22   :  { %v1497_v24 = vsub.f32 %v124_v19, %v188_v23  ;;  %vm107_vm8 = vcmp.eq.s32.totalorder %v71_v8, %v1479_v11  ;;  %vm171_vm9 = vcmp.eq.s32.totalorder %v71_v8, %v1470_v4  ;;  %vm91_vm10 = vcmp.eq.s32.totalorder %v55_v9, %v1479_v11 }
  0x23   :  { %v1502_v25 = vand.u32 4294901760, %v237_v20  ;;  %v1504_v26 = vand.u32 4294901760, %v221_v21  ;;  %v1506_v27 = vand.u32 4294901760, %v236_v22  ;;  %v139_v28 = vsel %vm107_vm8, 1.0, %v2279_v12 }
  0x24   :  { %v1510_v29 = vand.u32 4294901760, %v1497_v24  ;;  %v203_v30 = vsel %vm171_vm9, 1.0, %v2279_v12  ;;  %v123_v31 = vsel %vm91_vm10, 1.0, %v2279_v12  ;;  %vm155_vm11 = vcmp.eq.s32.totalorder %v55_v9, %v1470_v4 }
  0x25   :  { %1151 = vmatprep.subr.mxu0 %v1502_v25  ;;  %v1516_v32 = vsub.f32 %v139_v28, %v203_v30  ;;  %v187_v33 = vsel %vm155_vm11, 1.0, %v2279_v12  ;;  %vm106_vm12 = vcmp.eq.s32.totalorder %v70_v10, %v1479_v11  ;;  %vm170_vm13 = vcmp.eq.s32.totalorder %v70_v10, %v1470_v4 }
  0x26   :  { %1152 = vmatpush3.msra.mxu0 %v1504_v26  ;;  %v1522_v34 = vsub.f32 %v123_v31, %v187_v33  ;;  %v138_v35 = vsel %vm106_vm12, 1.0, %v2279_v12  ;;  %v202_v36 = vsel %vm170_vm13, 1.0, %v2279_v12  ;;  %v54_v37 = vadd.s32 96, %v1467_v1 }
  0x27   :  { %1153 = vmatprep.subr.mxu0 %v1506_v27  ;;  %v1529_v38 = vand.u32 4294901760, %v1516_v32  ;;  %v1531_v39 = vsub.f32 %v138_v35, %v202_v36  ;;  %v69_v40 = vadd.s32 216, %v1467_v1  ;;  %v1535_v41 = vsub.f32 %v237_v20, %v1502_v25 }
  0x28   :  { %1154 = vmatpush3.msra.mxu0 %v1510_v29  ;;  %v1539_v42 = vand.u32 4294901760, %v1522_v34  ;;  %vm90_vm14 = vcmp.eq.s32.totalorder %v54_v37, %v1479_v11  ;;  %vm154_vm15 = vcmp.eq.s32.totalorder %v54_v37, %v1470_v4  ;;  %v53_v43 = vadd.s32 88, %v1467_v1 }
  0x29   :  { %2342 = vst [vmem:[#allocation14_spill] sm:$0xff] %v1535_v41  ;;  %1155 = vmatprep.subr.mxu0 %v1529_v38  ;;  %v1546_v44 = vand.u32 4294901760, %v1531_v39  ;;  %v122_v45 = vsel %vm90_vm14, 1.0, %v2279_v12  ;;  %v186_v46 = vsel %vm154_vm15, 1.0, %v2279_v12  ;;  %vm105_vm0 = vcmp.eq.s32.totalorder %v69_v40, %v1479_v11 }
  0x2a   :  { %1156 = vmatpush3.msra.mxu0 %v1539_v42  ;;  %v1552_v47 = vsub.f32 %v122_v45, %v186_v46  ;;  %v137_v48 = vsel %vm105_vm0, 1.0, %v2279_v12  ;;  %vm169_vm1 = vcmp.eq.s32.totalorder %v69_v40, %v1470_v4  ;;  %v2278_v49 = vand.u32 4294901760, %v1535_v41 }
  0x2b   :  { %1157 = vmatprep.subr.mxu0 %v1546_v44  ;;  %v201_v50 = vsel %vm169_vm1, 1.0, %v2279_v12  ;;  %vm89_vm2 = vcmp.eq.s32.totalorder %v53_v43, %v1479_v11  ;;  %vm153_vm3 = vcmp.eq.s32.totalorder %v53_v43, %v1470_v4  ;;  %v1562_v51 = vsub.f32 %v221_v21, %v1504_v26 }
  0x2c   :  { %v1565_v52 = vand.u32 4294901760, %v1552_v47  ;;  %v1567_v53 = vsub.f32 %v137_v48, %v201_v50  ;;  %v466_v54 = vsub.f32 %v1535_v41, %v2278_v49  ;;  %v121_v55 = vsel %vm89_vm2, 1.0, %v2279_v12 }
  0x2d   :  { %v185_v56 = vsel %vm153_vm3, 1.0, %v2279_v12  ;;  %v2276_v57 = vand.u32 4294901760, %v1562_v51  ;;  %v68_v58 = vadd.s32 208, %v1467_v1  ;;  %v1577_v59 = vsub.f32 %v236_v22, %v1506_v27 }
  0x2e   :  { %1158 = vmatpush3.msra.mxu0 %v1565_v52  ;;  %v1581_v60 = vand.u32 4294901760, %v1567_v53  ;;  %v467_v61 = vand.u32 4294901760, %v466_v54  ;;  %v1583_v62 = vsub.f32 %v121_v55, %v185_v56  ;;  %v52_v63 = vadd.s32 80, %v1467_v1 }
  0x2f   :  { %v354_v0 = vsub.f32 %v1562_v51, %v2276_v57  ;;  %vm104_vm4 = vcmp.eq.s32.totalorder %v68_v58, %v1479_v11  ;;  %vm168_vm5 = vcmp.eq.s32.totalorder %v68_v58, %v1470_v4  ;;  %v2275_v2 = vand.u32 4294901760, %v1577_v59 }
  0x30   :  { %1159 = vmatprep.subr.mxu0 %v1581_v60  ;;  %1186 = vmatprep.subr.mxu1 %v467_v61  ;;  %v1594_v3 = vand.u32 4294901760, %v1583_v62  ;;  %v136_v5 = vsel %vm104_vm4, 1.0, %v2279_v12  ;;  %v200_v6 = vsel %vm168_vm5, 1.0, %v2279_v12  ;;  %vm88_vm6 = vcmp.eq.s32.totalorder %v52_v63, %v1479_v11 }
  0x31   :  { %v355_v7 = vand.u32 4294901760, %v354_v0  ;;  %v1599_v8 = vsub.f32 %v136_v5, %v200_v6  ;;  %v473_v9 = vsub.f32 %v1577_v59, %v2275_v2  ;;  %v120_v10 = vsel %vm88_vm6, 1.0, %v2279_v12 }
  0x32   :  { %1160 = vmatpush3.msra.mxu0 %v1594_v3  ;;  %vm152_vm7 = vcmp.eq.s32.totalorder %v52_v63, %v1470_v4  ;;  %v1609_v13 = vsub.f32 %v1497_v24, %v1510_v29  ;;  %v67_v14 = vadd.s32 200, %v1467_v1  ;;  %v1614_v15 = vsub.f32 %v1516_v32, %v1529_v38 }
  0x33   :  { %1187 = vmatpush3.msra.mxu1 %v355_v7  ;;  %v1617_v16 = vand.u32 4294901760, %v1599_v8  ;;  %v474_v17 = vand.u32 4294901760, %v473_v9  ;;  %v184_v18 = vsel %vm152_vm7, 1.0, %v2279_v12  ;;  %v51_v19 = vadd.s32 72, %v1467_v1 }
  0x34   :  { %v1621_v20 = vsub.f32 %v120_v10, %v184_v18  ;;  %v2273_v21 = vand.u32 4294901760, %v1609_v13  ;;  %vm103_vm8 = vcmp.eq.s32.totalorder %v67_v14, %v1479_v11  ;;  %vm167_vm9 = vcmp.eq.s32.totalorder %v67_v14, %v1470_v4 }
  0x35   :  { %1161 = vmatprep.subr.mxu0 %v1617_v16  ;;  %1188 = vmatprep.subr.mxu1 %v474_v17  ;;  %v135_v22 = vsel %vm103_vm8, 1.0, %v2279_v12  ;;  %v199_v23 = vsel %vm167_vm9, 1.0, %v2279_v12  ;;  %v2270_v24 = vand.u32 4294901760, %v1614_v15  ;;  %vm87_vm10 = vcmp.eq.s32.totalorder %v51_v19, %v1479_v11 }
  0x36   :  { %v1632_v28 = vand.u32 4294901760, %v1621_v20  ;;  %v361_v30 = vsub.f32 %v1609_v13, %v2273_v21  ;;  %v1637_v31 = vsub.f32 %v135_v22, %v199_v23  ;;  %v119_v32 = vsel %vm87_vm10, 1.0, %v2279_v12 }
  0x37   :  { %v480_v33 = vsub.f32 %v1614_v15, %v2270_v24  ;;  %vm151_vm11 = vcmp.eq.s32.totalorder %v51_v19, %v1470_v4  ;;  %v1646_v35 = vsub.f32 %v1522_v34, %v1539_v42  ;;  %v66_v36 = vadd.s32 192, %v1467_v1 }
  0x38   :  { %1162 = vmatpush3.msra.mxu0 %v1632_v28  ;;  %v362_v37 = vand.u32 4294901760, %v361_v30  ;;  %v1651_v40 = vand.u32 4294901760, %v1637_v31  ;;  %v183_v43 = vsel %vm151_vm11, 1.0, %v2279_v12  ;;  %v1656_v45 = vsub.f32 %v1531_v39, %v1546_v44 }
  0x39   :  { %v481_v46 = vand.u32 4294901760, %v480_v33  ;;  %v1658_v48 = vsub.f32 %v119_v32, %v183_v43  ;;  %v2269_v34 = vand.u32 4294901760, %v1646_v35  ;;  %vm102_vm12 = vcmp.eq.s32.totalorder %v66_v36, %v1479_v11 }
  0x3a   :  { %2343 = vst [vmem:[#allocation15_spill] sm:$0xff] %v1651_v40  ;;  %1189 = vmatpush3.msra.mxu1 %v362_v37  ;;  %1163 = vmatprep.subr.mxu0 %v1651_v40  ;;  %v134_v50 = vsel %vm102_vm12, 1.0, %v2279_v12  ;;  %vm166_vm13 = vcmp.eq.s32.totalorder %v66_v36, %v1470_v4  ;;  %v2268_v54 = vand.u32 4294901760, %v1656_v45  ;;  %v50_v55 = vadd.s32 64, %v1467_v1 }
  0x3b   :  { %1190 = vmatprep.subr.mxu1 %v481_v46  ;;  %v1668_v39 = vand.u32 4294901760, %v1658_v48  ;;  %v368_v56 = vsub.f32 %v1646_v35, %v2269_v34  ;;  %v198_v58 = vsel %vm166_vm13, 1.0, %v2279_v12  ;;  %v1676_v61 = vsub.f32 %v1552_v47, %v1565_v52 }
  0x3c   :  { %v1678_v63 = vsub.f32 %v134_v50, %v198_v58  ;;  %v487_v0 = vsub.f32 %v1656_v45, %v2268_v54  ;;  %vm86_vm14 = vcmp.eq.s32.totalorder %v50_v55, %v1479_v11  ;;  %vm150_vm15 = vcmp.eq.s32.totalorder %v50_v55, %v1470_v4 }
  0x3d   :  { %2344 = vst [vmem:[#allocation16_spill] sm:$0xff] %v1668_v39  ;;  %1164 = vmatpush3.msra.mxu0 %v1668_v39  ;;  %v369_v5 = vand.u32 4294901760, %v368_v56  ;;  %v118_v6 = vsel %vm86_vm14, 1.0, %v2279_v12  ;;  %v182_v7 = vsel %vm150_vm15, 1.0, %v2279_v12  ;;  %v2267_v47 = vand.u32 4294901760, %v1676_v61 }
  0x3e   :  { %v1690_v9 = vand.u32 4294901760, %v1678_v63  ;;  %v488_v10 = vand.u32 4294901760, %v487_v0  ;;  %v1692_v14 = vsub.f32 %v118_v6, %v182_v7  ;;  %v65_v17 = vadd.s32 184, %v1467_v1 }
  0x3f   :  { %1191 = vmatpush3.msra.mxu1 %v369_v5  ;;  %v375_v18 = vsub.f32 %v1676_v61, %v2267_v47  ;;  %v1700_v19 = vsub.f32 %v1567_v53, %v1581_v60  ;;  %v49_v22 = vadd.s32 56, %v1467_v1  ;;  %v1705_v23 = vsub.f32 %v1583_v62, %v1594_v3 }
  0x40   :  { %2345 = vst [vmem:[#allocation17_spill] sm:$0xff] %v1690_v9  ;;  %1165 = vmatprep.subr.mxu0 %v1690_v9  ;;  %1192 = vmatprep.subr.mxu1 %v488_v10  ;;  %v1709_v30 = vand.u32 4294901760, %v1692_v14  ;;  %vm101_vm0 = vcmp.eq.s32.totalorder %v65_v17, %v1479_v11  ;;  %vm165_vm1 = vcmp.eq.s32.totalorder %v65_v17, %v1470_v4  ;;  %v64_v32 = vadd.s32 176, %v1467_v1 }
  0x41   :  { %v376_v53 = vand.u32 4294901760, %v375_v18  ;;  %v133_v33 = vsel %vm101_vm0, 1.0, %v2279_v12  ;;  %v197_v36 = vsel %vm165_vm1, 1.0, %v2279_v12  ;;  %v2265_v62 = vand.u32 4294901760, %v1700_v19 }
  0x42   :  { %2346 = vst [vmem:[#allocation18_spill] sm:$0xff] %v1709_v30  ;;  %1166 = vmatpush3.msra.mxu0 %v1709_v30  ;;  %v1718_v37 = vsub.f32 %v133_v33, %v197_v36  ;;  %vm85_vm2 = vcmp.eq.s32.totalorder %v49_v22, %v1479_v11  ;;  %vm149_vm3 = vcmp.eq.s32.totalorder %v49_v22, %v1470_v4  ;;  %v2264_v43 = vand.u32 4294901760, %v1705_v23 }
  0x43   :  { %1193 = vmatpush3.msra.mxu1 %v376_v53  ;;  %v494_v46 = vsub.f32 %v1700_v19, %v2265_v62  ;;  %v117_v50 = vsel %vm85_vm2, 1.0, %v2279_v12  ;;  %v181_v55 = vsel %vm149_vm3, 1.0, %v2279_v12  ;;  %vm100_vm4 = vcmp.eq.s32.totalorder %v64_v32, %v1479_v11 }
  0x44   :  { %v1730_v56 = vand.u32 4294901760, %v1718_v37  ;;  %v1732_v58 = vsub.f32 %v117_v50, %v181_v55  ;;  %v382_v0 = vsub.f32 %v1705_v23, %v2264_v43  ;;  %v132_v5 = vsel %vm100_vm4, 1.0, %v2279_v12 }
  0x45   :  { %v495_v6 = vand.u32 4294901760, %v494_v46  ;;  %vm164_vm5 = vcmp.eq.s32.totalorder %v64_v32, %v1470_v4  ;;  %v1741_v7 = vsub.f32 %v1599_v8, %v1617_v16  ;;  %v48_v10 = vadd.s32 48, %v1467_v1 }
  0x46   :  { %2347 = vst [vmem:[#allocation19_spill] sm:$0xff] %v1730_v56  ;;  %1167 = vmatprep.subr.mxu0 %v1730_v56  ;;  %v1746_v17 = vand.u32 4294901760, %v1732_v58  ;;  %v383_v18 = vand.u32 4294901760, %v382_v0  ;;  %v196_v22 = vsel %vm164_vm5, 1.0, %v2279_v12  ;;  %v1751_v53 = vsub.f32 %v1621_v20, %v1632_v28 }
  0x47   :  { %1194 = vmatprep.subr.mxu1 %v495_v6  ;;  %v1753_v32 = vsub.f32 %v132_v5, %v196_v22  ;;  %v2262_v8 = vand.u32 4294901760, %v1741_v7  ;;  %vm84_vm6 = vcmp.eq.s32.totalorder %v48_v10, %v1479_v11  ;;  %vm148_vm7 = vcmp.eq.s32.totalorder %v48_v10, %v1470_v4 }
  0x48   :  { %2348 = vst [vmem:[#allocation20_spill] sm:$0xff] %v1746_v17  ;;  %1168 = vmatpush3.msra.mxu0 %v1746_v17  ;;  %1195 = vmatpush3.msra.mxu1 %v383_v18  ;;  %v116_v33 = vsel %vm84_vm6, 1.0, %v2279_v12  ;;  %v180_v36 = vsel %vm148_vm7, 1.0, %v2279_v12  ;;  %v2263_v46 = vand.u32 4294901760, %v1751_v53  ;;  %v63_v20 = vadd.s32 168, %v1467_v1 }
  0x49   :  { %v1764_v50 = vand.u32 4294901760, %v1753_v32  ;;  %v501_v55 = vsub.f32 %v1741_v7, %v2262_v8  ;;  %v1769_v0 = vsub.f32 %v116_v33, %v180_v36  ;;  %v1773_v5 = vsub.f32 %v1637_v31, %v1651_v40 }
  0x4a   :  { %v389_v6 = vsub.f32 %v1751_v53, %v2263_v46  ;;  %vm99_vm8 = vcmp.eq.s32.totalorder %v63_v20, %v1479_v11  ;;  %vm163_vm9 = vcmp.eq.s32.totalorder %v63_v20, %v1470_v4  ;;  %v47_v10 = vadd.s32 40, %v1467_v1 }
  0x4b   :  { %2349 = vst [vmem:[#allocation21_spill] sm:$0xff] %v1764_v50  ;;  %1169 = vmatprep.subr.mxu0 %v1764_v50  ;;  %v502_v18 = vand.u32 4294901760, %v501_v55  ;;  %v1783_v22 = vand.u32 4294901760, %v1769_v0  ;;  %v131_v33 = vsel %vm99_vm8, 1.0, %v2279_v12  ;;  %v195_v31 = vsel %vm163_vm9, 1.0, %v2279_v12 }
  0x4c   :  { %v390_v36 = vand.u32 4294901760, %v389_v6  ;;  %v1787_v8 = vsub.f32 %v131_v33, %v195_v31  ;;  %v2266_v46 = vand.u32 4294901760, %v1773_v5  ;;  %vm83_vm10 = vcmp.eq.s32.totalorder %v47_v10, %v1479_v11 }
  0x4d   :  { %2350 = vst [vmem:[#allocation22_spill] sm:$0xff] %v1783_v22  ;;  %1196 = vmatprep.subr.mxu1 %v502_v18  ;;  %1170 = vmatpush3.msra.mxu0 %v1783_v22  ;;  %v115_v20 = vsel %vm83_vm10, 1.0, %v2279_v12  ;;  %vm147_vm11 = vcmp.eq.s32.totalorder %v47_v10, %v1470_v4  ;;  %v1796_v55 = vsub.f32 %v1658_v48, %v1668_v39  ;;  %v62_v43 = vadd.s32 160, %v1467_v1 }
  0x4e   :  { %1197 = vmatpush3.msra.mxu1 %v390_v36  ;;  %v1800_v6 = vand.u32 4294901760, %v1787_v8  ;;  %v508_v18 = vsub.f32 %v1773_v5, %v2266_v46  ;;  %v179_v33 = vsel %vm147_vm11, 1.0, %v2279_v12  ;;  %v1808_v31 = vsub.f32 %v1678_v63, %v1690_v9 }
  0x4f   :  { %v1810_v10 = vsub.f32 %v115_v20, %v179_v33  ;;  %v2272_v48 = vand.u32 4294901760, %v1796_v55  ;;  %vm98_vm12 = vcmp.eq.s32.totalorder %v62_v43, %v1479_v11  ;;  %vm162_vm13 = vcmp.eq.s32.totalorder %v62_v43, %v1470_v4 }
  0x50   :  { %2351 = vst [vmem:[#allocation23_spill] sm:$0xff] %v1800_v6  ;;  %1171 = vmatprep.subr.mxu0 %v1800_v6  ;;  %v509_v36 = vand.u32 4294901760, %v508_v18  ;;  %v130_v62 = vsel %vm98_vm12, 1.0, %v2279_v12  ;;  %v194_v46 = vsel %vm162_vm13, 1.0, %v2279_v12  ;;  %v2271_v47 = vand.u32 4294901760, %v1808_v31 }
  0x51   :  { %v1820_v63 = vand.u32 4294901760, %v1810_v10  ;;  %v396_v20 = vsub.f32 %v1796_v55, %v2272_v48  ;;  %v1825_v33 = vsub.f32 %v130_v62, %v194_v46  ;;  %v46_v43 = vadd.s32 32, %v1467_v1 }
  0x52   :  { %1198 = vmatprep.subr.mxu1 %v509_v36  ;;  %v515_v18 = vsub.f32 %v1808_v31, %v2271_v47  ;;  %v1833_v54 = vsub.f32 %v1692_v14, %v1709_v30  ;;  %v61_v34 = vadd.s32 152, %v1467_v1  ;;  %v1838_v24 = vsub.f32 %v1718_v37, %v1730_v56 }
  0x53   :  { %2352 = vst [vmem:[#allocation24_spill] sm:$0xff] %v1820_v63  ;;  %1172 = vmatpush3.msra.mxu0 %v1820_v63  ;;  %v397_v62 = vand.u32 4294901760, %v396_v20  ;;  %v1842_v46 = vand.u32 4294901760, %v1825_v33  ;;  %vm82_vm14 = vcmp.eq.s32.totalorder %v46_v43, %v1479_v11  ;;  %vm146_vm15 = vcmp.eq.s32.totalorder %v46_v43, %v1470_v4 }
  0x54   :  { %v516_v36 = vand.u32 4294901760, %v515_v18  ;;  %v114_v14 = vsel %vm82_vm14, 1.0, %v2279_v12  ;;  %v178_v47 = vsel %vm146_vm15, 1.0, %v2279_v12  ;;  %v2274_v48 = vand.u32 4294901760, %v1833_v54 }
  0x55   :  { %2353 = vst [vmem:[#allocation25_spill] sm:$0xff] %v1842_v46  ;;  %1199 = vmatpush3.msra.mxu1 %v397_v62  ;;  %1173 = vmatprep.subr.mxu0 %v1842_v46  ;;  %v1850_v37 = vsub.f32 %v114_v14, %v178_v47  ;;  %vm97_vm0 = vcmp.eq.s32.totalorder %v61_v34, %v1479_v11  ;;  %v2277_v20 = vand.u32 4294901760, %v1838_v24  ;;  %v45_v62 = vadd.s32 24, %v1467_v1 }
  0x56   :  { %vm161_vm1 = vcmp.eq.s32.totalorder %v61_v34, %v1470_v4  ;;  %1200 = vmatprep.subr.mxu1 %v516_v36  ;;  %v403_v43 = vsub.f32 %v1833_v54, %v2274_v48  ;;  %v129_v18 = vsel %vm97_vm0, 1.0, %v2279_v12  ;;  %v1871_v36 = vsub.f32 %v1732_v58, %v1746_v17 }
  0x57   :  { %v193_v21 = vsel %vm161_vm1, 1.0, %v2279_v12  ;;  %v1862_v47 = vand.u32 4294901760, %v1850_v37  ;;  %v522_v34 = vsub.f32 %v1838_v24, %v2277_v20  ;;  %vm81_vm2 = vcmp.eq.s32.totalorder %v45_v62, %v1479_v11 }
  0x58   :  { %v1864_v14 = vsub.f32 %v129_v18, %v193_v21  ;;  %v404_v48 = vand.u32 4294901760, %v403_v43  ;;  %vm145_vm3 = vcmp.eq.s32.totalorder %v45_v62, %v1470_v4  ;;  %v60_v2 = vadd.s32 144, %v1467_v1 }
  0x59   :  { %2354 = vst [vmem:[#allocation26_spill] sm:$0xff] %v1862_v47  ;;  %1174 = vmatpush3.msra.mxu0 %v1862_v47  ;;  %v523_v18 = vand.u32 4294901760, %v522_v34  ;;  %v113_v57 = vsel %vm81_vm2, 1.0, %v2279_v12  ;;  %v177_v20 = vsel %vm145_vm3, 1.0, %v2279_v12  ;;  %v2285_v43 = vand.u32 4294901760, %v1871_v36 }
  0x5a   :  { %v1878_v21 = vand.u32 4294901760, %v1864_v14  ;;  %1201 = vmatpush3.msra.mxu1 %v404_v48  ;;  %v1882_v58 = vsub.f32 %v113_v57, %v177_v20  ;;  %vm96_vm4 = vcmp.eq.s32.totalorder %v60_v2, %v1479_v11  ;;  %vm160_vm5 = vcmp.eq.s32.totalorder %v60_v2, %v1470_v4 }
  0x5b   :  { %1202 = vmatprep.subr.mxu1 %v523_v18  ;;  %v128_v62 = vsel %vm96_vm4, 1.0, %v2279_v12  ;;  %v192_v34 = vsel %vm160_vm5, 1.0, %v2279_v12  ;;  %v1892_v49 = vsub.f32 %v1753_v32, %v1764_v50  ;;  %v44_v57 = vadd.s32 16, %v1467_v1 }
  0x5c   :  { %2355 = vst [vmem:[#allocation27_spill] sm:$0xff] %v1878_v21  ;;  %1175 = vmatprep.subr.mxu0 %v1878_v21  ;;  %v1896_v48 = vand.u32 4294901760, %v1882_v58  ;;  %v410_v2 = vsub.f32 %v1871_v36, %v2285_v43  ;;  %v1901_v20 = vsub.f32 %v128_v62, %v192_v34  ;;  %v1905_v18 = vsub.f32 %v1769_v0, %v1783_v22 }
  0x5d   :  { %v2292_v12 = vand.u32 4294901760, %v1892_v49  ;;  %vm80_vm6 = vcmp.eq.s32.totalorder %v44_v57, %v1479_v11  ;;  %vm144_vm7 = vcmp.eq.s32.totalorder %v44_v57, %v1470_v4  ;;  %v59_v32 = vadd.s32 136, %v1467_v1 }
  0x5e   :  { %2356 = vst [vmem:[#allocation28_spill] sm:$0xff] %v1896_v48  ;;  %1176 = vmatpush3.msra.mxu0 %v1896_v48  ;;  %v411_v50 = vand.u32 4294901760, %v410_v2  ;;  %v1913_v17 = vand.u32 4294901760, %v1901_v20  ;;  %v2358_v62 = vmov 0.0   ;;  %v2297_v57 = vand.u32 4294901760, %v1905_v18 }
  0x5f   :  { %v112_v34 = vsel %vm80_vm6, 1.0, %v2358_v62  ;;  %v176_v43 = vsel %vm144_vm7, 1.0, %v2358_v62  ;;  %v529_v0 = vsub.f32 %v1892_v49, %v2292_v12  ;;  %vm95_vm8 = vcmp.eq.s32.totalorder %v59_v32, %v1479_v11 }
  0x60   :  { %2357 = vst [vmem:[#allocation29_spill] sm:$0xff] %v1913_v17  ;;  %v1920_v22 = vsub.f32 %v112_v34, %v176_v43  ;;  %1203 = vmatpush3.msra.mxu1 %v411_v50  ;;  %1177 = vmatprep.subr.mxu0 %v1913_v17  ;;  %v127_v2 = vsel %vm95_vm8, 1.0, %v2358_v62  ;;  %vm159_vm9 = vcmp.eq.s32.totalorder %v59_v32, %v1470_v4  ;;  %v43_v30 = vadd.s32 8, %v1467_v1 }
  0x61   :  { %v1929_v56 = vsub.f32 %v1787_v8, %v1800_v6  ;;  %v530_v12 = vand.u32 4294901760, %v529_v0  ;;  %v417_v50 = vsub.f32 %v1905_v18, %v2297_v57  ;;  %v191_v34 = vsel %vm159_vm9, 1.0, %v2358_v62 }
  0x62   :  { %v1933_v43 = vand.u32 4294901760, %v1920_v22  ;;  %v223_v9 = vsub.f32 %v127_v2, %v191_v34  ;;  %vm79_vm10 = vcmp.eq.s32.totalorder %v43_v30, %v1479_v11  ;;  %vm143_vm11 = vcmp.eq.s32.totalorder %v43_v30, %v1470_v4 }
  0x63   :  { %2359 = vst [vmem:[#allocation30_spill] sm:$0xff] %v1929_v56  ;;  %v2300_v39 = vand.u32 4294901760, %v1929_v56  ;;  %1204 = vmatprep.subr.mxu1 %v530_v12  ;;  %v418_v8 = vand.u32 4294901760, %v417_v50  ;;  %v111_v32 = vsel %vm79_vm10, 1.0, %v2358_v62  ;;  %v175_v0 = vsel %vm143_vm11, 1.0, %v2358_v62 }
  0x64   :  { %2360 = vst [vmem:[#allocation31_spill] sm:$0xff] %v1933_v43  ;;  %1178 = vmatpush3.msra.mxu0 %v1933_v43  ;;  %v1947_v57 = vsub.f32 %v1810_v10, %v1820_v63  ;;  %v1949_v6 = vand.u32 4294901760, %v223_v9  ;;  %v207_v34 = vsub.f32 %v111_v32, %v175_v0  ;;  %v58_v12 = vadd.s32 128, %v1467_v1  ;;  %v38_v63 = vld [vmem:[#allocation4] sm:$0xff] }
  0x65   :  { %v536_v2 = vsub.f32 %v1929_v56, %v2300_v39  ;;  %1205 = vmatpush3.msra.mxu1 %v418_v8  ;;  %v1958_v50 = vsub.f32 %v1825_v33, %v1842_v46  ;;  %vm78_vm12 = vcmp.eq.s32.totalorder %v1467_v1, %v1479_v11  ;;  %vm142_vm13 = vcmp.eq.s32.totalorder %v1467_v1, %v1470_v4  ;;  %v39_v8 = vld [vmem:[#allocation4 + $0x8] sm:$0xff] }
  0x66   :  { %2361 = vst [vmem:[#allocation32_spill] sm:$0xff] %v1947_v57  ;;  %2362 = vst [vmem:[#allocation33_spill] sm:$0xff] %v1949_v6  ;;  %v2305_v30 = vand.u32 4294901760, %v1947_v57  ;;  %1179 = vmatprep.subr.mxu0 %v1949_v6  ;;  %v1965_v39 = vand.u32 4294901760, %v207_v34  ;;  %vm94_vm14 = vcmp.eq.s32.totalorder %v58_v12, %v1479_v11  ;;  %vm158_vm15 = vcmp.eq.s32.totalorder %v58_v12, %v1470_v4 }
  0x67   :  { %v537_v10 = vand.u32 4294901760, %v536_v2  ;;  %v126_v32 = vsel %vm94_vm14, 1.0, %v2358_v62  ;;  %v190_v0 = vsel %vm158_vm15, 1.0, %v2358_v62  ;;  %v110_v12 = vsel %vm78_vm12, 1.0, %v2358_v62 }
  0x68   :  { %v424_v33 = vsub.f32 %v1947_v57, %v2305_v30  ;;  %1180 = vmatpush3.msra.mxu0 %v1965_v39  ;;  %v222_v2 = vsub.f32 %v126_v32, %v190_v0  ;;  %v174_v30 = vsel %vm142_vm13, 1.0, %v2358_v62  ;;  %v1986_v57 = vsub.f32 %v1850_v37, %v1862_v47 }
  0x69   :  { %1206 = vmatprep.subr.mxu1 %v537_v10  ;;  %v2363_v10 = vand.u32 4294901760, %v1958_v50  ;;  %v206_v32 = vsub.f32 %v110_v12, %v174_v30  ;;  %v1991_v0 = vand.u32 4294901760, %v39_v8  ;;  %v1998_v4 = vsub.f32 %v1864_v14, %v1878_v21 }
  0x6a   :  { %v425_v46 = vand.u32 4294901760, %v424_v33  ;;  %v1993_v56 = vand.u32 4294901760, %v222_v2  ;;  %v2313_v11 = vand.u32 4294901760, %v1986_v57  ;;  %v2000_v62 = vand.u32 4294901760, %v38_v63 }
  0x6b   :  { %v543_v40 = vsub.f32 %v1958_v50, %v2363_v10  ;;  %2364 = vst [vmem:[#allocation34_spill] sm:$0xff] %v1991_v0  ;;  %v2002_v33 = vand.u32 4294901760, %v206_v32  ;;  %v2005_v1 = vsub.f32 %v39_v8, %v1991_v0  ;;  %v2009_v30 = vsub.f32 %v1882_v58, %v1896_v48  ;;  %575 = vmatprep.mubr.f32.mxu1 %v1991_v0 }
  0x6c   :  { %2365 = vst [vmem:[#allocation35_spill] sm:$0xff] %v2000_v62  ;;  %1207 = vmatpush3.msra.mxu1 %v425_v46  ;;  %1181 = vmatprep.subr.mxu0 %v1993_v56  ;;  %v431_v14 = vsub.f32 %v1986_v57, %v2313_v11  ;;  %v2318_v46 = vand.u32 4294901760, %v1998_v4  ;;  %v2022_v8 = vsub.f32 %v1901_v20, %v1913_v17 }
  0x6d   :  { %v544_v37 = vand.u32 4294901760, %v543_v40  ;;  %v2018_v40 = vsub.f32 %v38_v63, %v2000_v62  ;;  %1182 = vmatpush3.msra.mxu0 %v2002_v33  ;;  %v2029_v10 = vsub.f32 %v1920_v22, %v1933_v43  ;;  %v2032_v11 = vsub.f32 %v223_v9, %v1949_v6 }
  0x6e   :  { %v432_v63 = vand.u32 4294901760, %v431_v14  ;;  %v550_v20 = vsub.f32 %v1998_v4, %v2318_v46  ;;  %1221 = vmatprep.subr.mxu0 %v1535_v41  ;;  %v2329_v58 = vand.u32 4294901760, %v2022_v8  ;;  %v2366_v12 = vand.u32 4294901760, %v2005_v1 }
  0x6f   :  { %1208 = vmatprep.subr.mxu1 %v544_v37  ;;  %v2326_v37 = vand.u32 4294901760, %v2018_v40  ;;  %v2367_v22 = vand.u32 4294901760, %v2009_v30  ;;  %v2334_v14 = vand.u32 4294901760, %v2029_v10  ;;  %v2333_v6 = vand.u32 4294901760, %v2032_v11 }
  0x70   :  { %v337_v0 = vsub.f32 %v2005_v1, %v2366_v12  ;;  %1209 = vmatpush3.msra.mxu1 %v432_v63  ;;  %v551_v46 = vand.u32 4294901760, %v550_v20  ;;  %v557_v17 = vsub.f32 %v2022_v8, %v2329_v58  ;;  %v2055_v12 = vsub.f32 %v207_v34, %v1965_v39 }
  0x71   :  { %v438_v9 = vsub.f32 %v2009_v30, %v2367_v22  ;;  %v343_v43 = vsub.f32 %v2018_v40, %v2326_v37  ;;  %v445_v22 = vsub.f32 %v2029_v10, %v2334_v14  ;;  %v564_v63 = vsub.f32 %v2032_v11, %v2333_v6  ;;  %v2385_v6 = vld [vmem:[#allocation14_spill] sm:$0xff] }
  0x72   :  { %2368 = vst [vmem:[#allocation36_spill] sm:$0xff] %v2055_v12  ;;  %v338_v48 = vand.u32 4294901760, %v337_v0  ;;  %1210 = vmatprep.subr.mxu1 %v551_v46  ;;  %v558_v37 = vand.u32 4294901760, %v557_v17  ;;  %v2332_v21 = vand.u32 4294901760, %v2055_v12  ;;  %v2065_v58 = vsub.f32 %v222_v2, %v1993_v56 }
  0x73   :  { %v439_v41 = vand.u32 4294901760, %v438_v9  ;;  %v344_v20 = vand.u32 4294901760, %v343_v43  ;;  %v446_v34 = vand.u32 4294901760, %v445_v22  ;;  %v565_v0 = vand.u32 4294901760, %v564_v63  ;;  %v2371_v22 = vld [vmem:[#allocation30_spill] sm:$0xff]  ;;  %v2372_v63 = vld [vmem:[#allocation15_spill] sm:$0xff] }
  0x74   :  { %2369 = vst [vmem:[#allocation37_spill] sm:$0xff] %v2065_v58  ;;  %339 = vmatprep.mubr.f32.mxu0 %v338_v48  ;;  %v2068_v9 = vsub.f32 %v206_v32, %v2002_v33  ;;  %v452_v46 = vsub.f32 %v2055_v12, %v2332_v21  ;;  %v2331_v17 = vand.u32 4294901760, %v2065_v58  ;;  %v2384_v21 = vld [vmem:[#allocation27_spill] sm:$0xff]  ;;  %v2386_v14 = vand.u32 4294901760, %v2385_v6 }
  0x75   :  { %1211 = vmatpush3.msra.mxu1 %v439_v41  ;;  %345 = vmatmul.mubr.f32.vlgmr.msra.gmra.mxu0 %v344_v20  ;;  %v2373_v20 = vld [vmem:[#allocation32_spill] sm:$0xff]  ;;  %v2394_v6 = vand.u32 4294901760, %v1614_v15 }
  0x76   :  { %2370 = vst [vmem:[#allocation38_spill] sm:$0xff] %v2068_v9  ;;  %1212 = vmatprep.subr.mxu1 %v558_v37  ;;  %1222 = vmatpush3.msra.mxu0 %v1562_v51  ;;  %v2330_v43 = vand.u32 4294901760, %v2068_v9  ;;  %v453_v41 = vand.u32 4294901760, %v452_v46  ;;  %v571_v48 = vsub.f32 %v2065_v58, %v2331_v17  ;;  %v2376_v46 = vld [vmem:[#allocation18_spill] sm:$0xff]  ;;  %v2383_v17 = vld [vmem:[#allocation25_spill] sm:$0xff] }
  0x77   :  { %1213 = vmatpush3.msra.mxu1 %v446_v34  ;;  %1223 = vmatprep.subr.mxu0 %v1577_v59  ;;  %v2374_v34 = vld [vmem:[#allocation16_spill] sm:$0xff] }
  0x78   :  { %1214 = vmatprep.subr.mxu1 %v565_v0  ;;  %1224 = vmatpush3.msra.mxu0 %v1609_v13  ;;  %v459_v2 = vsub.f32 %v2068_v9, %v2330_v43  ;;  %v572_v32 = vand.u32 4294901760, %v571_v48  ;;  %v2375_v0 = vld [vmem:[#allocation17_spill] sm:$0xff]  ;;  %v2378_v48 = vld [vmem:[#allocation20_spill] sm:$0xff] }
  0x79   :  { %712 = vmatprep.mubr.f32.mxu0 %v2005_v1  ;;  %1225 = vmatprep.subr.mxu0 %v1614_v15  ;;  %v2382_v43 = vld [vmem:[#allocation24_spill] sm:$0xff]  ;;  %v2399_v15 = vand.u32 4294901760, %v2018_v40 }
  0x7a   :  { %1215 = vmatpush3.msra.mxu1 %v453_v41  ;;  %1226 = vmatpush3.msra.mxu0 %v1646_v35  ;;  %v460_v37 = vand.u32 4294901760, %v459_v2  ;;  %v2377_v41 = vld [vmem:[#allocation19_spill] sm:$0xff]  ;;  %v2379_v2 = vld [vmem:[#allocation21_spill] sm:$0xff] }
  0x7b   :  { %1216 = vmatprep.subr.mxu1 %v572_v32  ;;  %1227 = vmatprep.subr.mxu0 %v1656_v45  ;;  %v2380_v32 = vld [vmem:[#allocation22_spill] sm:$0xff] }
  0x7c   :  { %1217 = vmatpush3.msra.mxu1 %v460_v37  ;;  %1228 = vmatpush3.msra.mxu0 %v1676_v61  ;;  %v2381_v37 = vld [vmem:[#allocation23_spill] sm:$0xff] }
  0x7d   :  { %577 = vmatmul.mubr.f32.vlgmr.msra.gmra.mxu1 %v2000_v62  ;;  %1229 = vmatprep.subr.mxu0 %v1700_v19  ;;  %v2387_v62 = vld [vmem:[#allocation28_spill] sm:$0xff] }
  0x7e   :  { %1256 = vmatprep.subr.mxu1 %v1502_v25  ;;  %1230 = vmatpush3.msra.mxu0 %v1705_v23 }
  0x7f   :  { %1257 = vmatpush3.msra.mxu1 %v1504_v26  ;;  %1231 = vmatprep.subr.mxu0 %v1741_v7 }
  0x80   :  { %1258 = vmatprep.subr.mxu1 %v1506_v27  ;;  %1232 = vmatpush3.msra.mxu0 %v1751_v53 }
  0x81   :  { %1259 = vmatpush3.msra.mxu1 %v1510_v29  ;;  %1233 = vmatprep.subr.mxu0 %v1773_v5 }
  0x82   :  { %1260 = vmatprep.subr.mxu1 %v1529_v38  ;;  %1234 = vmatpush3.msra.mxu0 %v1796_v55 }
  0x83   :  { %1261 = vmatpush3.msra.mxu1 %v1539_v42  ;;  %1235 = vmatprep.subr.mxu0 %v1808_v31 }
  0x84   :  { %1262 = vmatprep.subr.mxu1 %v1546_v44  ;;  %1236 = vmatpush3.msra.mxu0 %v1833_v54 }
  0x85   :  { %1263 = vmatpush3.msra.mxu1 %v1565_v52  ;;  %1237 = vmatprep.subr.mxu0 %v1838_v24 }
  0x86   :  { %1264 = vmatprep.subr.mxu1 %v1581_v60  ;;  %1238 = vmatpush3.msra.mxu0 %v1871_v36 }
  0x87   :  { %1265 = vmatpush3.msra.mxu1 %v1594_v3  ;;  %1239 = vmatprep.subr.mxu0 %v1892_v49 }
  0x88   :  { %1266 = vmatprep.subr.mxu1 %v1617_v16  ;;  %1240 = vmatpush3.msra.mxu0 %v1905_v18 }
  0x89   :  { %1267 = vmatpush3.msra.mxu1 %v1632_v28  ;;  %1241 = vmatprep.subr.mxu0 %v2371_v22 }
  0x8a   :  { %1268 = vmatprep.subr.mxu1 %v2372_v63  ;;  %1242 = vmatpush3.msra.mxu0 %v2373_v20 }
  0x8b   :  { %1269 = vmatpush3.msra.mxu1 %v2374_v34  ;;  %1243 = vmatprep.subr.mxu0 %v1958_v50 }
  0x8c   :  { %1270 = vmatprep.subr.mxu1 %v2375_v0  ;;  %1244 = vmatpush3.msra.mxu0 %v1986_v57 }
  0x8d   :  { %1271 = vmatpush3.msra.mxu1 %v2376_v46  ;;  %1245 = vmatprep.subr.mxu0 %v1998_v4 }
  0x8e   :  { %1272 = vmatprep.subr.mxu1 %v2377_v41  ;;  %1246 = vmatpush3.msra.mxu0 %v2009_v30 }
  0x8f   :  { %1273 = vmatpush3.msra.mxu1 %v2378_v48  ;;  %1247 = vmatprep.subr.mxu0 %v2022_v8 }
  0x90   :  { %1274 = vmatprep.subr.mxu1 %v2379_v2  ;;  %1248 = vmatpush3.msra.mxu0 %v2029_v10 }
  0x91   :  { %1275 = vmatpush3.msra.mxu1 %v2380_v32  ;;  %1249 = vmatprep.subr.mxu0 %v2032_v11 }
  0x92   :  { %1276 = vmatprep.subr.mxu1 %v2381_v37  ;;  %1250 = vmatpush3.msra.mxu0 %v2055_v12  ;;  %v2388_v12 = vand.u32 4294901760, %v1562_v51  ;;  %v2395_v51 = vand.u32 4294901760, %v1646_v35  ;;  %v2401_v35 = vand.u32 4294901760, %v1705_v23  ;;  %v2421_v23 = vld [vmem:[#allocation36_spill] sm:$0xff] }
  0x93   :  { %1277 = vmatpush3.msra.mxu1 %v2382_v43  ;;  %1251 = vmatprep.subr.mxu0 %v2065_v58  ;;  %v2389_v43 = vld [vmem:[#allocation29_spill] sm:$0xff] }
  0x94   :  { %1278 = vmatprep.subr.mxu1 %v2383_v17  ;;  %1252 = vmatpush3.msra.mxu0 %v2068_v9  ;;  %v2390_v17 = vand.u32 4294901760, %v1577_v59  ;;  %v2391_v9 = vld [vmem:[#allocation31_spill] sm:$0xff]  ;;  %v2393_v58 = vld [vmem:[#allocation33_spill] sm:$0xff]  ;;  %v2396_v59 = vand.u32 4294901760, %v1656_v45  ;;  %v2402_v45 = vand.u32 4294901760, %v1741_v7  ;;  %v2422_v7 = vand.u32 4294901760, %v2421_v23 }
  0x95   :  { %1279 = vmatpush3.msra.mxu1 %v1862_v47  ;;  %715 = vmatmul.mubr.f32.vlgmr.msra.gmra.mxu0 %v2018_v40  ;;  %v2392_v47 = vand.u32 4294901760, %v1609_v13  ;;  %v2397_v13 = vand.u32 4294901760, %v2005_v1  ;;  %v2403_v1 = vand.u32 4294901760, %v1751_v53  ;;  %v2423_v53 = vld [vmem:[#allocation24_spill] sm:$0xff] }
  0x96   :  { %1280 = vmatprep.subr.mxu1 %v2384_v21  ;;  %1291 = vmatprep.subr.mxu0 %v2386_v14  ;;  %v2400_v14 = vand.u32 4294901760, %v1700_v19  ;;  %v2420_v19 = vand.u32 4294901760, %v2032_v11  ;;  %v2431_v11 = vld [vmem:[#allocation35_spill] sm:$0xff] }
  0x97   :  { %1281 = vmatpush3.msra.mxu1 %v2387_v62  ;;  %1292 = vmatpush3.msra.mxu0 %v2388_v12 }
  0x98   :  { %1282 = vmatprep.subr.mxu1 %v2389_v43  ;;  %1293 = vmatprep.subr.mxu0 %v2390_v17  ;;  %v40_v17 = vld [vmem:[#allocation7] sm:$0xff] }
  0x99   :  { %1283 = vmatpush3.msra.mxu1 %v2391_v9  ;;  %1294 = vmatpush3.msra.mxu0 %v2392_v47  ;;  %v2398_v47 = vand.u32 4294901760, %v1676_v61  ;;  %v2404_v61 = vand.u32 4294901760, %v1773_v5  ;;  %v2424_v5 = vld [vmem:[#allocation37_spill] sm:$0xff] }
  0x9a   :  { %1284 = vmatprep.subr.mxu1 %v2393_v58  ;;  %1295 = vmatprep.subr.mxu0 %v2394_v6 }
  0x9b   :  { %1285 = vmatpush3.msra.mxu1 %v1965_v39  ;;  %1296 = vmatpush3.msra.mxu0 %v2395_v51 }
  0x9c   :  { %1286 = vmatprep.subr.mxu1 %v1993_v56  ;;  %1297 = vmatprep.subr.mxu0 %v2396_v59 }
  0x9d   :  { %1287 = vmatpush3.msra.mxu1 %v2002_v33  ;;  %819 = vmatprep.mubr.f32.mxu1 %v2397_v13 }
  0x9e   :  { %1298 = vmatpush3.msra.mxu0 %v2398_v47  ;;  %823 = vmatmul.mubr.f32.vlgmr.msra.gmra.mxu1 %v2399_v15 }
  0x9f   :  { %1299 = vmatprep.subr.mxu0 %v2400_v14  ;;  %1326 = vmatprep.subr.mxu1 %v1502_v25  ;;  %v2405_v25 = vand.u32 4294901760, %v1796_v55  ;;  %v2425_v55 = vand.u32 4294901760, %v2424_v5 }
  0xa0   :  { %1300 = vmatpush3.msra.mxu0 %v2401_v35  ;;  %1327 = vmatpush3.msra.mxu1 %v1504_v26  ;;  %v2406_v26 = vand.u32 4294901760, %v1808_v31  ;;  %v2426_v31 = vld [vmem:[#allocation25_spill] sm:$0xff] }
  0xa1   :  { %1301 = vmatprep.subr.mxu0 %v2402_v45  ;;  %1328 = vmatprep.subr.mxu1 %v1506_v27  ;;  %v2407_v27 = vand.u32 4294901760, %v1833_v54  ;;  %v2419_v54 = vand.u32 4294901760, %v2029_v10 }
  0xa2   :  { %1302 = vmatpush3.msra.mxu0 %v2403_v1  ;;  %1329 = vmatpush3.msra.mxu1 %v1510_v29  ;;  %v2408_v29 = vand.u32 4294901760, %v1838_v24  ;;  %v2417_v24 = vand.u32 4294901760, %v2009_v30 }
  0xa3   :  { %1303 = vmatprep.subr.mxu0 %v2404_v61  ;;  %1330 = vmatprep.subr.mxu1 %v1529_v38  ;;  %v2409_v38 = vand.u32 4294901760, %v1871_v36  ;;  %v2427_v36 = vld [vmem:[#allocation38_spill] sm:$0xff] }
  0xa4   :  { %1304 = vmatpush3.msra.mxu0 %v2405_v25  ;;  %1331 = vmatpush3.msra.mxu1 %v1539_v42  ;;  %v2410_v42 = vand.u32 4294901760, %v1892_v49  ;;  %v2414_v49 = vand.u32 4294901760, %v1958_v50  ;;  %v2430_v50 = vld [vmem:[#allocation26_spill] sm:$0xff] }
  0xa5   :  { %1305 = vmatprep.subr.mxu0 %v2406_v26  ;;  %1332 = vmatprep.subr.mxu1 %v1546_v44  ;;  %v2411_v44 = vand.u32 4294901760, %v1905_v18  ;;  %v2428_v18 = vand.u32 4294901760, %v2427_v36 }
  0xa6   :  { %1306 = vmatpush3.msra.mxu0 %v2407_v27  ;;  %1333 = vmatpush3.msra.mxu1 %v1565_v52  ;;  %v2412_v52 = vand.u32 4294901760, %v2371_v22 }
  0xa7   :  { %1307 = vmatprep.subr.mxu0 %v2408_v29  ;;  %1334 = vmatprep.subr.mxu1 %v1581_v60  ;;  %v2413_v60 = vand.u32 4294901760, %v2373_v20 }
  0xa8   :  { %1308 = vmatpush3.msra.mxu0 %v2409_v38  ;;  %1335 = vmatpush3.msra.mxu1 %v1594_v3  ;;  %v2415_v3 = vand.u32 4294901760, %v1986_v57  ;;  %v2429_v57 = vld [vmem:[#allocation34_spill] sm:$0xff] }
  0xa9   :  { %1309 = vmatprep.subr.mxu0 %v2410_v42  ;;  %1336 = vmatprep.subr.mxu1 %v1617_v16  ;;  %v2416_v16 = vand.u32 4294901760, %v1998_v4 }
  0xaa   :  { %1310 = vmatpush3.msra.mxu0 %v2411_v44  ;;  %1337 = vmatpush3.msra.mxu1 %v1632_v28  ;;  %v2418_v28 = vand.u32 4294901760, %v2022_v8  ;;  %v1127_v44 = vstv %s2258_s0 }
  0xab   :  { %1311 = vmatprep.subr.mxu0 %v2412_v52  ;;  %1338 = vmatprep.subr.mxu1 %v2372_v63 }
  0xac   :  { %1312 = vmatpush3.msra.mxu0 %v2413_v60  ;;  %1339 = vmatpush3.msra.mxu1 %v2374_v34 }
  0xad   :  { %1313 = vmatprep.subr.mxu0 %v2414_v49  ;;  %1340 = vmatprep.subr.mxu1 %v2375_v0  ;;  %v2432_v49 = vld [vmem:[#allocation13_spill] sm:$0xff] }
  0xae   :  { %1314 = vmatpush3.msra.mxu0 %v2415_v3  ;;  %1341 = vmatpush3.msra.mxu1 %v2376_v46  ;;  %vm1128_vm1 = vcmp.lt.s32.totalorder %v2432_v49, %v1127_v44 }
  0xaf   :  { %1315 = vmatprep.subr.mxu0 %v2416_v16  ;;  %1342 = vmatprep.subr.mxu1 %v2377_v41 }
  0xb0   :  { %1316 = vmatpush3.msra.mxu0 %v2417_v24  ;;  %1343 = vmatpush3.msra.mxu1 %v2378_v48 }
  0xb1   :  { %1317 = vmatprep.subr.mxu0 %v2418_v28  ;;  %1344 = vmatprep.subr.mxu1 %v2379_v2 }
  0xb2   :  { %1318 = vmatpush3.msra.mxu0 %v2419_v54  ;;  %1345 = vmatpush3.msra.mxu1 %v2380_v32 }
  0xb3   :  { %1319 = vmatprep.subr.mxu0 %v2420_v19  ;;  %1346 = vmatprep.subr.mxu1 %v2381_v37 }
  0xb4   :  { %1320 = vmatpush3.msra.mxu0 %v2422_v7  ;;  %1347 = vmatpush3.msra.mxu1 %v2423_v53 }
  0xb5   :  { %1321 = vmatprep.subr.mxu0 %v2425_v55  ;;  %1348 = vmatprep.subr.mxu1 %v2426_v31 }
  0xb6   :  { %1322 = vmatpush3.msra.mxu0 %v2428_v18  ;;  %989 = vmatprep.mubr.f32.mxu0 %v2429_v57 }
  0xb7   :  { %1349 = vmatpush3.msra.mxu1 %v2430_v50  ;;  %991 = vmatmul.mubr.f32.vlgmr.msra.gmra.mxu0 %v2431_v11 }
  0xb8   :  { %1350 = vmatprep.subr.mxu1 %v2384_v21  ;;  %1093 = vmatprep.mubr.f32.mxu1 %v2429_v57 }
  0xb9   :  { %1351 = vmatpush3.msra.mxu1 %v2387_v62 }
  0xba   :  { %1352 = vmatprep.subr.mxu1 %v2389_v43 }
  0xbb   :  { %1353 = vmatpush3.msra.mxu1 %v2391_v9 }
  0xbc   :  { %1354 = vmatprep.subr.mxu1 %v2393_v58 }
  0xbd   :  { %1355 = vmatpush3.msra.mxu1 %v1965_v39  ;;  %v1100_v39 = vcvt.s32.f32 %v40_v17 }
  0xbe   :  { %1356 = vmatprep.subr.mxu1 %v1993_v56 }
  0xbf   :  { %1357 = vmatpush3.msra.mxu1 %v2002_v33  ;;  %v1101_v0 = vmul.f32 2.0, %v1100_v39 }
  0xc0   :  { %1095 = vmatmul.mubr.f32.vlgmr.msra.gmra.mxu1 %v2431_v11 }
  0xc1   :  { %v1150_v37 = vadd.f32 -1.0, %v1101_v0 }
 0x135   :  { %v1183_v4 = vpop.f32.mrf.mxu0 }
 0x137   :  { %v1184_v21 = vpop.f32.mrf.mxu0 }
 0x138   :  { %v1185_v58 = vadd.f32 %v1184_v21, %v1183_v4 }
 0x13d   :  { %v1218_v30 = vpop.f32.mrf.mxu1 }
 0x13f   :  { %v1219_v8 = vpop.f32.mrf.mxu1 }
 0x140   :  { %v1220_v9 = vadd.f32 %v1219_v8, %v1218_v30 }
 0x142   :  { %v579_v56 = vadd.f32 %v1220_v9, %v1185_v58 }
 0x155   :  { %v1253_v40 = vpop.f32.mrf.mxu0 }
 0x157   :  { %v1254_v62 = vpop.f32.mrf.mxu0 }
 0x158   :  { %v1255_v22 = vadd.f32 %v1254_v62, %v1253_v40 }
 0x15a   :  { %v717_v33 = vadd.f32 %v1255_v22, %v579_v56 }
 0x15e   :  { %v1288_v10 = vpop.f32.mrf.mxu1 }
 0x160   :  { %v1289_v43 = vpop.f32.mrf.mxu1 }
 0x161   :  { %v1290_v20 = vadd.f32 %v1289_v43, %v1288_v10 }
 0x163   :  { %v825_v41 = vadd.f32 %v1290_v20, %v717_v33 }
 0x177   :  { %v1323_v12 = vpop.f32.mrf.mxu0 }
 0x179   :  { %v1324_v63 = vpop.f32.mrf.mxu0 }
 0x17a   :  { %v1325_v34 = vadd.f32 %v1324_v63, %v1323_v12 }
 0x17c   :  { %v993_v2 = vadd.f32 %v1325_v34, %v825_v41 }
 0x180   :  { %v1358_v46 = vpop.f32.mrf.mxu1 }
 0x182   :  { %v1359_v48 = vpop.f32.mrf.mxu1 }
 0x183   :  { %v1360_v32 = vadd.f32 %v1359_v48, %v1358_v46 }
 0x185   :  { %v1097_v6 = vadd.f32 %v1360_v32, %v993_v2 }
 0x187   :  { %v1103_v51 = vmul.f32 %v1150_v37, %v1097_v6 }
 0x189   :  { %v1104_v59 = vand.u32 2147483647, %v1103_v51  ;;  %v1110_v35 = vsub.f32 0.0, %v1103_v51  ;;  %vm1115_vm0 = vcmp.le.f32.partialorder %v1103_v51, 0.0 }
 0x18b   :  { %v1105_v13 = vsub.f32 0.0, %v1104_v59  ;;  %v1111_v25 = vmax.f32 %v1110_v35, 0.0 }
 0x18d   :  { %v1106_v47 = vmul.f32 1.442695, %v1105_v13 }
 0x18f   :  { %1365 = vpow2.f32 %v1106_v47 }
 0x19c   :  { %v1366_v15 = vpop.eup %1365 }
 0x19d   :  { %v1108_v14 = vadd.f32 1.0, %v1366_v15 }
 0x19f   :  { %1367 = vrcp.f32 %v1108_v14 }
 0x1a0   :  { %1369 = vlog2.f32 %v1108_v14 }
 0x1ac   :  { %v1368_v45 = vpop.eup %1367 }
 0x1ad   :  { %v1370_v1 = vpop.eup %1369  ;;  %v1116_v61 = vmul.f32 %v1368_v45, %v1366_v15 }
 0x1ae   :  { %v1113_v26 = vmul.f32 0.6931472, %v1370_v1 }
 0x1af   :  { %v1117_v27 = vsel %vm1115_vm0, %v1368_v45, %v1116_v61 }
 0x1b0   :  { %v1114_v29 = vadd.f32 %v1113_v26, %v1111_v25  ;;  %v1118_v38 = vmax.f32 %v1117_v27, 1e-07 }
 0x1b2   :  { %v1119_v42 = vmin.f32 %v1118_v38, 1.0  ;;  %v1121_v60 = vmul.f32 0.1, %v1114_v29 }
 0x1b4   :  { %v1120_v52 = vmul.f32 9.2103405, %v1119_v42 }
 0x1b6   :  { %v1122_v3 = vadd.f32 %v1121_v60, %v1120_v52 }
 0x1b8   :  { %v1131_v16 = vsel %vm1128_vm1, %v1122_v3, 0.0 }
 0x1b9   :  { %1133 = vst [vmem:[#allocation9] sm:$0xff] %v1131_v16 }
 0x1ba   :  { %1422 = shalt.err (!%p1419_p0)
}
 0x1bb   :  { %1143 = dma.vmem_to_hbm [thread:$0]  %s1141_s23, 128, %s2261_s3, [#allocation6]  }
 0x1bc   :  { %1435 = dma.done.wait [#allocation6], 128  }
 0x1bd   :  { %1436 = vsyncadd [#allocation6], 4294967168 }
 0x1be   :  { %1147 = vsyncpa [#allocation5], 1 }
 0x1bf   :  { %1148 = vsyncpa [#allocation8], 1 }
 0x1c0   :  { %1149 = vsyncpa [#allocation6], 1 }

</bundles_post_ra>
